<compile_context>
chip_gen: v7x
topology: tpu7x:2x2x1
jax: 0.10.0
libtpu: 0.0.40
codegen_flags: <defaults>
</compile_context>

<pallas_src>
import jax
import jax.numpy as jnp
from jax.experimental import pallas as pl
from jax.experimental.pallas import tpu as pltpu


def _round_up(n, m):
    return ((n + m - 1) // m) * m


def classifier_kernel(x_ref, w1_ref, b1_ref, w23_ref, b23_ref, o_ref):
    """Fused MLP head: (Linear+BN folded) -> LeakyReLU -> (Linear2*Linear3)."""
    x = x_ref[...]

    # Linear 1 (D -> D//4) with BatchNorm already folded into W1/b1.
    h = jnp.dot(x, w1_ref[...], preferred_element_type=jnp.float32) + b1_ref[...]
    # LeakyReLU (negative_slope=0.01, PyTorch default). Dropout = identity (eval).
    h = jnp.where(h > 0, h, 0.01 * h)

    # Collapsed Linear2 @ Linear3 (D//4 -> T_padded), lane-dense output.
    o = jnp.dot(h, w23_ref[...], preferred_element_type=jnp.float32) + b23_ref[...]
    o_ref[...] = o.astype(o_ref.dtype)


def classifier_forward(x, params, *, tile_b=128, lane_pad=128):
    """x: (B, D) float32. Returns (B, target_size) float32."""
    B, D = x.shape
    w1, b1, bn_gamma, bn_beta, bn_mean, bn_var, w2, b2, w3, b3 = params
    H1 = w1.shape[1]      # D // 4
    T = w3.shape[1]       # target_size

    # ---- eval-mode algebraic folds (plain-JAX glue) -------------------------
    eps = 1e-5
    scale = bn_gamma * jax.lax.rsqrt(bn_var + eps)          # (H1,)
    shift = bn_beta - bn_mean * scale                       # (H1,)
    w1f = w1 * scale[None, :]                               # (D, H1)
    b1f = (b1 * scale + shift).reshape(1, H1)

    w23 = w2 @ w3                                           # (H1, T)
    b23 = b2 @ w3 + b3                                      # (T,)

    # Zero-pad classifier dim to a lane-dense multiple of 128.
    Tp = _round_up(max(T, lane_pad), lane_pad)
    w23p = jnp.zeros((H1, Tp), w23.dtype).at[:, :T].set(w23)
    b23p = jnp.zeros((1, Tp), b23.dtype).at[0, :T].set(b23)

    # ---- batch tiling (pad ragged batches instead of asserting) -------------
    tile = min(tile_b, _round_up(B, 8))
    Bp = _round_up(B, tile)
    if Bp != B:
        x = jnp.zeros((Bp, D), x.dtype).at[:B].set(x)
    grid = (Bp // tile,)

    # Replicated (grid-invariant) operands map to block (0, 0).
    rep = lambda shape: pl.BlockSpec(shape, lambda i: (0, 0))

    # VMEM budget guard: only raise the scoped limit if the tiles need it
    # (relevant when tile_b / D are pushed large, esp. on v7x's 64 MiB VMEM).
    est_bytes = (2 * tile * (D + Tp) * 4            # double-buffered x/out tiles
                 + 2 * (D * H1 + H1 + H1 * Tp + Tp) * 4)   # resident weights
    vmem_limit = int(min(100 * 2**20, 2 * est_bytes)) if est_bytes > 32 * 2**20 else None

    out = pl.pallas_call(
        classifier_kernel,
        out_shape=jax.ShapeDtypeStruct((Bp, Tp), jnp.float32),
        grid_spec=pltpu.PrefetchScalarGridSpec(
            num_scalar_prefetch=0,
            grid=grid,
            in_specs=[
                pl.BlockSpec((tile, D), lambda i: (i, 0)),  # x tile
                rep((D, H1)),    # folded w1
                rep((1, H1)),    # folded b1
                rep((H1, Tp)),   # collapsed w2@w3 (lane-padded)
                rep((1, Tp)),    # collapsed bias (lane-padded)
            ],
            out_specs=pl.BlockSpec((tile, Tp), lambda i: (i, 0)),
        ),
        compiler_params=pltpu.CompilerParams(
            dimension_semantics=("parallel",),
            vmem_limit_bytes=vmem_limit),
    )(x, w1f, b1f, w23p, b23p)

    return out[:B, :T]


def init_params(key, dimension, target_size):
    """Deterministic PyTorch-style (uniform +/- 1/sqrt(fan_in)) init."""
    h1 = dimension // 4
    h2 = h1 // 4
    ks = jax.random.split(key, 6)

    def linear_init(kw, kb, fan_in, fan_out):
        bound = 1.0 / jnp.sqrt(float(fan_in))
        w = jax.random.uniform(kw, (fan_in, fan_out), jnp.float32, -bound, bound)
        b = jax.random.uniform(kb, (fan_out,), jnp.float32, -bound, bound)
        return w, b

    w1, b1 = linear_init(ks[0], ks[1], dimension, h1)
    w2, b2 = linear_init(ks[2], ks[3], h1, h2)
    w3, b3 = linear_init(ks[4], ks[5], h2, target_size)

    # Give BN non-trivial (but deterministic) running stats so the fold is tested.
    bn_gamma = 1.0 + 0.1 * jnp.arange(h1, dtype=jnp.float32) / h1
    bn_beta = 0.05 * jnp.ones((h1,), jnp.float32)
    bn_mean = 0.01 * jnp.arange(h1, dtype=jnp.float32) / h1
    bn_var = jnp.ones((h1,), jnp.float32) * 0.9

    return (w1, b1, bn_gamma, bn_beta, bn_mean, bn_var, w2, b2, w3, b3)


def reference_forward(x, params):
    """Pure-JAX reference (mirrors the PyTorch module in eval mode)."""
    w1, b1, g, bta, mu, var, w2, b2, w3, b3 = params
    eps = 1e-5
    h = x @ w1 + b1
    h = (h - mu) * jax.lax.rsqrt(var + eps) * g + bta
    h = jnp.where(h > 0, h, 0.01 * h)
    h = h @ w2 + b2
    return h @ w3 + b3


if __name__ == "__main__":
    # Small demo shapes: dimension divisible by 16, batch exercises 2 grid steps.
    B, DIM, TARGET = 256, 256, 4

    key = jax.random.PRNGKey(0)
    kx, kp = jax.random.split(key)
    x = jax.random.normal(kx, (B, DIM), jnp.float32)
    params = init_params(kp, DIM, TARGET)

    out = classifier_forward(x, params, tile_b=128)
    out = jax.block_until_ready(out)

    ref = reference_forward(x, params)
    assert out.shape == (B, TARGET)
    assert jnp.allclose(out, ref, atol=1e-4, rtol=1e-4), "mismatch vs reference"

    # Also check a ragged / tiny batch path (padding logic).
    out_small = jax.block_until_ready(classifier_forward(x[:13], params))
    assert jnp.allclose(out_small, ref[:13], atol=1e-4, rtol=1e-4), "ragged mismatch"

    print("KERNEL_OK")
</pallas_src>

<mosaic_0001>
module attributes {stable_mosaic.version = 11 : i64} {
  func.func @classifier_kernel(%arg0: i32, %arg1: memref<128x256xf32, #tpu.memory_space<vmem>>, %arg2: memref<256x64xf32, #tpu.memory_space<vmem>>, %arg3: memref<1x64xf32, #tpu.memory_space<vmem>>, %arg4: memref<64x128xf32, #tpu.memory_space<vmem>>, %arg5: memref<1x128xf32, #tpu.memory_space<vmem>>, %arg6: memref<128x128xf32, #tpu.memory_space<vmem>>) attributes {dimension_semantics = [#tpu.dimension_semantics<parallel>], iteration_bounds = array<i64: 2>, scalar_prefetch = 0 : i64, scratch_operands = 0 : i64, tpu.core_type = #tpu.core_type<tc>, window_params = [{transform_indices = @transform_0, window_bounds = array<i64: 128, 256>}, {pipeline_mode = #tpu.pipeline_mode<synchronous>, transform_indices = @transform_1, window_bounds = array<i64: 256, 64>}, {pipeline_mode = #tpu.pipeline_mode<synchronous>, transform_indices = @transform_2, window_bounds = array<i64: 1, 64>}, {pipeline_mode = #tpu.pipeline_mode<synchronous>, transform_indices = @transform_3, window_bounds = array<i64: 64, 128>}, {pipeline_mode = #tpu.pipeline_mode<synchronous>, transform_indices = @transform_4, window_bounds = array<i64: 1, 128>}, {transform_indices = @transform_5, window_bounds = array<i64: 128, 128>}]} {
    %c0 = arith.constant 0 : index
    %c0_0 = arith.constant 0 : index
    %0 = vector.load %arg1[%c0, %c0_0] : memref<128x256xf32, #tpu.memory_space<vmem>>, vector<128x256xf32>
    %c0_1 = arith.constant 0 : index
    %c0_2 = arith.constant 0 : index
    %1 = vector.load %arg2[%c0_1, %c0_2] : memref<256x64xf32, #tpu.memory_space<vmem>>, vector<256x64xf32>
    %cst = arith.constant dense<0.000000e+00> : vector<128x64xf32>
    %2 = tpu.matmul %0, %1, %cst {dimension_numbers = #tpu.dot_dimension_numbers<[1], [0], [0], [1], [0, 0, 1, 1], [], []>} : vector<128x256xf32>, vector<256x64xf32>, vector<128x64xf32> -> vector<128x64xf32>
    %c0_3 = arith.constant 0 : index
    %c0_4 = arith.constant 0 : index
    %3 = vector.load %arg3[%c0_3, %c0_4] : memref<1x64xf32, #tpu.memory_space<vmem>>, vector<1x64xf32>
    %4 = vector.broadcast %3 : vector<1x64xf32> to vector<128x64xf32>
    %5 = arith.addf %2, %4 : vector<128x64xf32>
    %cst_5 = arith.constant 0.000000e+00 : f32
    %6 = vector.broadcast %cst_5 : f32 to vector<128x64xf32>
    %7 = arith.cmpf ogt, %5, %6 : vector<128x64xf32>
    %cst_6 = arith.constant 0.00999999977 : f32
    %8 = vector.broadcast %cst_6 : f32 to vector<128x64xf32>
    %9 = arith.mulf %8, %5 : vector<128x64xf32>
    %10 = arith.select %7, %5, %9 : vector<128x64xi1>, vector<128x64xf32>
    %c0_7 = arith.constant 0 : index
    %c0_8 = arith.constant 0 : index
    %11 = vector.load %arg4[%c0_7, %c0_8] : memref<64x128xf32, #tpu.memory_space<vmem>>, vector<64x128xf32>
    %cst_9 = arith.constant dense<0.000000e+00> : vector<128x128xf32>
    %12 = tpu.matmul %10, %11, %cst_9 {dimension_numbers = #tpu.dot_dimension_numbers<[1], [0], [0], [1], [0, 0, 1, 1], [], []>} : vector<128x64xf32>, vector<64x128xf32>, vector<128x128xf32> -> vector<128x128xf32>
    %c0_10 = arith.constant 0 : index
    %c0_11 = arith.constant 0 : index
    %13 = vector.load %arg5[%c0_10, %c0_11] : memref<1x128xf32, #tpu.memory_space<vmem>>, vector<1x128xf32>
    %14 = vector.broadcast %13 : vector<1x128xf32> to vector<128x128xf32>
    %15 = arith.addf %12, %14 : vector<128x128xf32>
    %c0_12 = arith.constant 0 : index
    %c0_13 = arith.constant 0 : index
    %16 = vector.load %arg6[%c0_12, %c0_13] : memref<128x128xf32, #tpu.memory_space<vmem>>, vector<128x128xf32>
    tpu.vector_store %arg6[%c0_12, %c0_13], %15 {strides = array<i32>} : memref<128x128xf32, #tpu.memory_space<vmem>>, vector<128x128xf32>,
    return
  }
  func.func @transform_0(%arg0: i32) -> (i32, i32) {
    %c0_i32 = arith.constant 0 : i32
    %c0_i32_0 = arith.constant 0 : i32
    return %arg0, %c0_i32 : i32, i32
  }
  func.func @transform_1(%arg0: i32) -> (i32, i32) {
    %c0_i32 = arith.constant 0 : i32
    %c0_i32_0 = arith.constant 0 : i32
    %c0_i32_1 = arith.constant 0 : i32
    return %c0_i32, %c0_i32_0 : i32, i32
  }
  func.func @transform_2(%arg0: i32) -> (i32, i32) {
    %c0_i32 = arith.constant 0 : i32
    %c0_i32_0 = arith.constant 0 : i32
    %c0_i32_1 = arith.constant 0 : i32
    return %c0_i32, %c0_i32_0 : i32, i32
  }
  func.func @transform_3(%arg0: i32) -> (i32, i32) {
    %c0_i32 = arith.constant 0 : i32
    %c0_i32_0 = arith.constant 0 : i32
    %c0_i32_1 = arith.constant 0 : i32
    return %c0_i32, %c0_i32_0 : i32, i32
  }
  func.func @transform_4(%arg0: i32) -> (i32, i32) {
    %c0_i32 = arith.constant 0 : i32
    %c0_i32_0 = arith.constant 0 : i32
    %c0_i32_1 = arith.constant 0 : i32
    return %c0_i32, %c0_i32_0 : i32, i32
  }
  func.func @transform_5(%arg0: i32) -> (i32, i32) {
    %c0_i32 = arith.constant 0 : i32
    %c0_i32_0 = arith.constant 0 : i32
    return %arg0, %c0_i32 : i32, i32
  }
}

</mosaic_0001>

<bundles_post_ra>
// kernel: tpu_custom_call.1
= control target key start
LH: loop header
LB: loop body
LE: loop exit
PB: predicated region body
PF: predicated region fallthrough
CT: control target
= control target key end

     0   :  { %10 = vsyncpa [#allocation3], 0  ;;  %s1638_s0 = inlined_call_operand.hbm [shape: f32[256,256], index: 0, kind: input, shape index: {}]   ;;  %s1639_s1 = inlined_call_operand.vmem [shape: f32[256,64], index: 1, kind: input, shape index: {}]   ;;  %s1640_s2 = inlined_call_operand.vmem [shape: f32[1,64], index: 2, kind: input, shape index: {}]   ;;  %s1641_s3 = inlined_call_operand.vmem [shape: f32[64,128], index: 3, kind: input, shape index: {}]   ;;  %s1642_s4 = inlined_call_operand.vmem [shape: f32[1,128], index: 4, kind: input, shape index: {}]   ;;  %s1643_s5 = inlined_call_operand.hbm [shape: f32[256,128], index: 5, kind: output, shape index: {}]  }
   0x1   :  { %12 = vsyncpa [#allocation3 + $0x1], 0 }
   0x2   :  { %13 = vsyncpa [#allocation4], 0 }
   0x3   :  { %15 = vsyncpa [#allocation4 + $0x1], 0  ;;  %s1250_s18 = smov 0   ;;  %s1252_s19 = smov 0  }
   0x4   :  { %s1254_s20 = smov 0   ;;  %s1256_s21 = smov 0  }
   0x5 LB: > { %s1271_s22 = sadd.s32 4294967295, %s1212_s21   ;;  %s822_s23 = sadd.s32 4294967294, %s1212_s21   ;;  %s1212_s21 = sphi %s1256_s21, %s1656_s21   ;;  %s1208_s20 = sphi %s1254_s20, %s1655_s20   ;;  %s1204_s19 = sphi %s1252_s19, %s1654_s19   ;;  %s1200_s18 = sphi %s1250_s18, %s1653_s18  }
   0x6   : > { %s1275_s24 = sadd.s32 1, %s1212_s21   ;;  %s28_s25 = sadd.s32 1, %s1208_s20 }
   0x7   : > { %s25_s26 = ssub.s32 %s1212_s21, %s1275_s24  ;;  %p35_p0 = scmp.ne.s32.totalorder %s1208_s20, %s1204_s19 }
   0x8   : > { %p26_p1 = scmp.eq.s32.totalorder %s25_s26, 0  ;;  %p36_p2 = scmp.eq.s32.totalorder %s1212_s21, 0 }
   0x9   : > { %p41_p3 = scmp.ne.s32.totalorder %s1204_s19, %s1200_s18  ;;  %p42_p4 = scmp.eq.s32.totalorder %s1271_s22, 0 }
   0xa   : > { %s1287_s27 = scalar_select %p26_p1, %s1208_s20, %s28_s25  }
   0xb   : > { %p1289_p5 = por %p36_p2, %p35_p0  ;;  %p1293_p6 = por %p42_p4, %p41_p3 }
   0xc   : > { %p149_p7 = scmp.eq.s32.totalorder %s1271_s22, 1  ;;  %p155_p8 = scmp.eq.s32.totalorder %s822_s23, 1 }
   0xd   : > { %p1078_p10 = scmp.lt.s32.totalorder %s1212_s21, 2  ;;  %s187_s7 = sand.u32 1, %s1208_s20  }
   0xe   : > { %p1300_p11 = por %p149_p7, %p35_p0  ;;  %p1304_p12 = por %p155_p8, %p41_p3 }
   0xf   : > { %s856_s8 = sshll.u32 %s1212_s21, 12  ;;  %s825_s9 = sshll.u32 %s187_s7, 8 }
  0x10   : > { %s1647_s30 = scalar_select %p1300_p11, 1, 0 }
  0x11   : > { %s1648_s6 = scalar_select %p1304_p12, 1, 0 }
  0x12   : > { %s1313_s12 = scalar_lea.hbm %s1638_s0, %s856_s8  ;;  %s191_s13 = scalar_lea.vmem [#allocation2], %s825_s9 }
  0x13   : > { %s199_s14 = sshll.u32 %s191_s13, 4  ;;  %p1317_p13 = pnand %p1078_p10, %p1289_p5  ;;  %s1321_s14 = int_to_ptr.vmem [resolvable:$true] %s199_s14 }
  0x14   : > { %s1323_s16 = scalar_lea.sflag [#allocation3], %s187_s7  ;;  %s1116_s17 = scalar_lea.hbm %s1313_s12, 4096 }
  0x15   : > { %p1117_p0 = scmp.ne.s32.totalorder %s1313_s12, %s1116_s17  ;;  %p1118_p1 = pneg %p1317_p13 }
  0x16   : > { %s1121_s26 = scalar_lea.hbm %s1638_s0, 8192  ;;  %p1122_p4 = scmp.lt.u32.totalorder %s1313_s12, %s1638_s0 }
  0x17   : > { %p1119_p2 = pnand %p1118_p1, %p1117_p0  ;;  %p1123_p5 = scmp.lt.u32.totalorder %s1121_s26, %s1116_s17 }
  0x18   : > { %p1125_p8 = scmp.lt.u32.totalorder %s1116_s17, %s1313_s12 }
  0x19   : > { %p1120_p3 = pneg %p1119_p2  ;;  %p1124_p7 = por %p1123_p5, %p1122_p4 }
  0x1b   : > { %p1126_p10 = por %p1125_p8, %p1124_p7 }
  0x1d   : > { %p1127_p9 = pnand %p1126_p10, %p1120_p3 }
  0x1f   : > { %1130 = shalt.err (!%p1127_p9)
}
  0x20   : > { %s1131_s7 = scalar_lea.vmem %s1321_s14, 4096  ;;  %s1214_s9 = smov [#allocation2]  }
  0x21   : > { %p1132_p0 = scmp.ne.s32.totalorder %s1321_s14, %s1131_s7  ;;  %s1136_s10 = sshll.u32 %s1214_s9, 4  ;;  %s1137_s10 = int_to_ptr.vmem [resolvable:$false] %s1136_s10 }
  0x22   : > { %s1138_s11 = scalar_lea.vmem %s1137_s10, 8192  ;;  %p1139_p11 = scmp.lt.s32.totalorder %s1321_s14, %s1137_s10 }
  0x23   : > { %p1134_p2 = pnand %p1132_p0, %p1118_p1  ;;  %p1140_p4 = scmp.lt.s32.totalorder %s1138_s11, %s1131_s7 }
  0x25   : > { %p1135_p12 = pneg %p1134_p2  ;;  %p1141_p5 = por %p1140_p4, %p1139_p11 }
  0x27   : > { %p1142_p7 = pnand %p1141_p5, %p1135_p12 }
  0x29   : > { %1145 = shalt.err (!%p1142_p7)
}
  0x2a   : > { %s1215_s13 = smov 256   ;;  %s1216_s17 = smov 16  }
  0x2b   : > { %1073 = dma.hbm_to_vmem [thread:$0]  (!%p1317_p13), %s1313_s12, 4096, %s1321_s14, %s1323_s16, %s1215_s13, %s1215_s13, %s1216_s17  }
  0x2c   : > { %p829_p9 = scmp.ge.s32.totalorder %s1212_s21, 1  ;;  %p207_p1 = scmp.lt.s32.totalorder %s1212_s21, 3 }
  0x2e   : > { %p208_p3 = pnand %p829_p9, %p207_p1 }
  0x2f   : > { %s1354_s23 = sand.u32 (!%p208_p3), 1, %s1204_s19  }
  0x30   : > { %211 = sbr.rel (%p208_p3) target bundleno = 593 (0x251), region = 40  ;;  %s830_s25 = sshll.u32 (!%p208_p3), %s1354_s23, 8 }
  0x31   : > { %s214_s26 = scalar_lea.sflag (!%p208_p3), [#allocation3], %s1354_s23  ;;  %s1358_s28 = scalar_lea.vmem (!%p208_p3), [#allocation2], %s830_s25 }
  0x37   : > { %1191 = dma.done.wait (%p1293_p6), %s214_s26, 4096  }
  0x38   : > { %1193 = vsyncadd (%p1293_p6), %s214_s26, 4294963200  ;;  %v294_v0 = vld [vmem:[%s1639_s1 + $0x80] sm:$0xff]  ;;  %v295_v1 = vld [vmem:[%s1639_s1 + $0x88] sm:$0xff]  ;;  %vm525_vm1 = vcmask 523264   ;;  %s831_s17 = sshll.u32 %s1354_s23, 7  ;;  %s857_s14 = sshll.u32 %s1271_s22, 11 }
  0x39   : > { %v278_v2 = vld [vmem:[%s1639_s1] sm:$0xff]  ;;  %v1002_v3 = vpack.c.bf16 %v295_v1, %v294_v0  ;;  %v279_v4 = vld [vmem:[%s1639_s1 + $0x8] sm:$0xff]  ;;  %v296_v5 = vld [vmem:[%s1639_s1 + $0x90] sm:$0xff]  ;;  %s1569_s12 = scalar_lea.vmem [#allocation5], %s831_s17  ;;  %s1590_s7 = scalar_lea.hbm %s1643_s5, %s857_s14 }
  0x3a   : > { %v297_v6 = vld [vmem:[%s1639_s1 + $0x98] sm:$0xff]  ;;  %v1004_v7 = vpack.c.bf16 %v279_v4, %v278_v2  ;;  %v280_v9 = vld [vmem:[%s1639_s1 + $0x10] sm:$0xff]  ;;  %v298_v11 = vld [vmem:[%s1639_s1 + $0xa0] sm:$0xff]  ;;  %s749_s15 = sshll.u32 %s1569_s12, 4  ;;  %s736_s22 = scalar_lea.sflag [#allocation4], %s1354_s23  ;;  %s1592_s15 = int_to_ptr.vmem [resolvable:$true] %s749_s15 }
  0x3b   : > { %v1006_v8 = vpack.c.bf16 %v297_v6, %v296_v5  ;;  %v281_v10 = vld [vmem:[%s1639_s1 + $0x18] sm:$0xff]  ;;  %1003 = vmatprep.subr.bf16.mxu0 %v1002_v3  ;;  %v299_v12 = vld [vmem:[%s1639_s1 + $0xa8] sm:$0xff]  ;;  %1050 = vmatprep.subr.bf16.mxu1 %v1002_v3  ;;  %v282_v15 = vld [vmem:[%s1639_s1 + $0x20] sm:$0xff]  ;;  %p1650_p11 = scmp.ne.s32.totalorder %s1647_s30, 0  ;;  %s1217_s9 = smov [#allocation5]  }
  0x3c   : > { %1005 = vmatpush3.bf16.msra.mxu0 %v1004_v7  ;;  %v1008_v13 = vpack.c.bf16 %v281_v10, %v280_v9  ;;  %1058 = vmatpush3.bf16.msra.mxu1 %v1004_v7  ;;  %v1010_v14 = vpack.c.bf16 %v299_v12, %v298_v11  ;;  %v283_v16 = vld [vmem:[%s1639_s1 + $0x28] sm:$0xff]  ;;  %v300_v17 = vld [vmem:[%s1639_s1 + $0xb0] sm:$0xff]  ;;  %v301_v18 = vld [vmem:[%s1639_s1 + $0xb8] sm:$0xff]  ;;  %s1150_s10 = sshll.u32 %s1217_s9, 4  ;;  %s1151_s10 = int_to_ptr.vmem [resolvable:$false] %s1150_s10 }
  0x3d   : > { %1007 = vmatprep.subr.bf16.mxu0 %v1006_v8  ;;  %1051 = vmatprep.subr.bf16.mxu1 %v1006_v8  ;;  %v1012_v19 = vpack.c.bf16 %v283_v16, %v282_v15  ;;  %v1014_v20 = vpack.c.bf16 %v301_v18, %v300_v17  ;;  %v284_v21 = vld [vmem:[%s1639_s1 + $0x30] sm:$0xff]  ;;  %v285_v22 = vld [vmem:[%s1639_s1 + $0x38] sm:$0xff]  ;;  %v302_v23 = vld [vmem:[%s1639_s1 + $0xc0] sm:$0xff]  ;;  %s1152_s11 = scalar_lea.vmem %s1151_s10, 4096  ;;  %p1153_p8 = scmp.lt.s32.totalorder %s1592_s15, %s1151_s10 }
  0x3e   : > { %v303_v24 = vld [vmem:[%s1639_s1 + $0xc8] sm:$0xff]  ;;  %v1016_v26 = vpack.c.bf16 %v285_v22, %v284_v21  ;;  %v286_v28 = vld [vmem:[%s1639_s1 + $0x40] sm:$0xff]  ;;  %v304_v30 = vld [vmem:[%s1639_s1 + $0xd0] sm:$0xff] }
  0x3f   : > { %v247_v25 = vld [vmem:[%s1358_s28 + $0x8] sm:$0xff]  ;;  %v1018_v27 = vpack.c.bf16 %v303_v24, %v302_v23  ;;  %v305_v31 = vld [vmem:[%s1639_s1 + $0xd8] sm:$0xff]  ;;  %v288_v34 = vld [vmem:[%s1639_s1 + $0x50] sm:$0xff] }
  0x40   : > { %1009 = vmatpush3.bf16.msra.mxu0 %v1008_v13  ;;  %1059 = vmatpush3.bf16.msra.mxu1 %v1008_v13  ;;  %v287_v29 = vld [vmem:[%s1639_s1 + $0x48] sm:$0xff]  ;;  %v1022_v33 = vpack.c.bf16 %v305_v31, %v304_v30  ;;  %v289_v35 = vld [vmem:[%s1639_s1 + $0x58] sm:$0xff]  ;;  %v306_v37 = vld [vmem:[%s1639_s1 + $0xe0] sm:$0xff] }
  0x41   : > { %1011 = vmatprep.subr.bf16.mxu0 %v1010_v14  ;;  %1052 = vmatprep.subr.bf16.mxu1 %v1010_v14  ;;  %v1020_v32 = vpack.c.bf16 %v287_v29, %v286_v28  ;;  %v271_v36 = vld [vmem:[%s1358_s28 + $0xc8] sm:$0xff]  ;;  %v1024_v39 = vpack.c.bf16 %v289_v35, %v288_v34  ;;  %v290_v41 = vld [vmem:[%s1639_s1 + $0x60] sm:$0xff]  ;;  %v308_v43 = vld [vmem:[%s1639_s1 + $0xf0] sm:$0xff] }
  0x42   : > { %381 = vmatprep.mubr.f32.mxu0 %v247_v25  ;;  %v307_v38 = vld [vmem:[%s1639_s1 + $0xe8] sm:$0xff]  ;;  %441 = vmatprep.mubr.f32.mxu1 %v271_v36  ;;  %v309_v44 = vld [vmem:[%s1639_s1 + $0xf8] sm:$0xff]  ;;  %v292_v47 = vld [vmem:[%s1639_s1 + $0x70] sm:$0xff] }
  0x43   : > { %v1026_v40 = vpack.c.bf16 %v307_v38, %v306_v37  ;;  %v291_v42 = vld [vmem:[%s1639_s1 + $0x68] sm:$0xff]  ;;  %v1030_v46 = vpack.c.bf16 %v309_v44, %v308_v43  ;;  %v293_v48 = vld [vmem:[%s1639_s1 + $0x78] sm:$0xff]  ;;  %v510_v49 = vld [vmem:[%s1641_s3] sm:$0xff] }
  0x44   : > { %1013 = vmatpush3.bf16.msra.mxu0 %v1012_v19  ;;  %1060 = vmatpush3.bf16.msra.mxu1 %v1012_v19  ;;  %v1028_v45 = vpack.c.bf16 %v291_v42, %v290_v41  ;;  %v511_v50 = vld [vmem:[%s1641_s3 + $0x8] sm:$0xff]  ;;  %v1032_v51 = vpack.c.bf16 %v293_v48, %v292_v47  ;;  %v246_v53 = vld [vmem:[%s1358_s28] sm:$0xff]  ;;  %v249_v55 = vld [vmem:[%s1358_s28 + $0x18] sm:$0xff] }
  0x45   : > { %1015 = vmatprep.subr.bf16.mxu0 %v1014_v20  ;;  %1053 = vmatprep.subr.bf16.mxu1 %v1014_v20  ;;  %v1034_v52 = vpack.c.bf16 %v511_v50, %v510_v49  ;;  %v270_v54 = vld [vmem:[%s1358_s28 + $0xc0] sm:$0xff]  ;;  %v273_v56 = vld [vmem:[%s1358_s28 + $0xd8] sm:$0xff]  ;;  %v248_v57 = vld [vmem:[%s1358_s28 + $0x10] sm:$0xff] }
  0x46   : > { %v272_v58 = vld [vmem:[%s1358_s28 + $0xd0] sm:$0xff]  ;;  %v251_v59 = vld [vmem:[%s1358_s28 + $0x28] sm:$0xff]  ;;  %v250_v61 = vld [vmem:[%s1358_s28 + $0x20] sm:$0xff] }
  0x47   : > { %v275_v60 = vld [vmem:[%s1358_s28 + $0xe8] sm:$0xff]  ;;  %v274_v62 = vld [vmem:[%s1358_s28 + $0xe0] sm:$0xff]  ;;  %v253_v63 = vld [vmem:[%s1358_s28 + $0x38] sm:$0xff] }
  0x48   : > { %1017 = vmatpush3.bf16.msra.mxu0 %v1016_v26  ;;  %1061 = vmatpush3.bf16.msra.mxu1 %v1016_v26  ;;  %v277_v0 = vld [vmem:[%s1358_s28 + $0xf8] sm:$0xff]  ;;  %v252_v1 = vld [vmem:[%s1358_s28 + $0x30] sm:$0xff]  ;;  %v255_v3 = vld [vmem:[%s1358_s28 + $0x48] sm:$0xff] }
  0x49   : > { %1019 = vmatprep.subr.bf16.mxu0 %v1018_v27  ;;  %1054 = vmatprep.subr.bf16.mxu1 %v1018_v27  ;;  %v276_v2 = vld [vmem:[%s1358_s28 + $0xf0] sm:$0xff]  ;;  %v254_v4 = vld [vmem:[%s1358_s28 + $0x40] sm:$0xff]  ;;  %v257_v5 = vld [vmem:[%s1358_s28 + $0x58] sm:$0xff] }
  0x4a   : > { %v256_v6 = vld [vmem:[%s1358_s28 + $0x50] sm:$0xff]  ;;  %v259_v7 = vld [vmem:[%s1358_s28 + $0x68] sm:$0xff]  ;;  %v258_v8 = vld [vmem:[%s1358_s28 + $0x60] sm:$0xff] }
  0x4b   : > { %v261_v9 = vld [vmem:[%s1358_s28 + $0x78] sm:$0xff]  ;;  %v260_v10 = vld [vmem:[%s1358_s28 + $0x70] sm:$0xff]  ;;  %v263_v11 = vld [vmem:[%s1358_s28 + $0x88] sm:$0xff] }
  0x4c   : > { %1021 = vmatpush3.bf16.msra.mxu0 %v1020_v32  ;;  %1062 = vmatpush3.bf16.msra.mxu1 %v1020_v32  ;;  %v262_v12 = vld [vmem:[%s1358_s28 + $0x80] sm:$0xff]  ;;  %v265_v13 = vld [vmem:[%s1358_s28 + $0x98] sm:$0xff]  ;;  %v264_v14 = vld [vmem:[%s1358_s28 + $0x90] sm:$0xff] }
  0x4d   : > { %1023 = vmatprep.subr.bf16.mxu0 %v1022_v33  ;;  %1055 = vmatprep.subr.bf16.mxu1 %v1022_v33  ;;  %v267_v15 = vld [vmem:[%s1358_s28 + $0xa8] sm:$0xff]  ;;  %v266_v16 = vld [vmem:[%s1358_s28 + $0xa0] sm:$0xff]  ;;  %v269_v17 = vld [vmem:[%s1358_s28 + $0xb8] sm:$0xff] }
  0x4e   : > { %v268_v18 = vld [vmem:[%s1358_s28 + $0xb0] sm:$0xff]  ;;  %v513_v20 = vld [vmem:[%s1641_s3 + $0x18] sm:$0xff]  ;;  %v514_v22 = vld [vmem:[%s1641_s3 + $0x20] sm:$0xff]  ;;  %s1146_s28 = scalar_lea.vmem %s1592_s15, 2048 }
  0x4f   : > { %v512_v19 = vld [vmem:[%s1641_s3 + $0x10] sm:$0xff]  ;;  %v515_v23 = vld [vmem:[%s1641_s3 + $0x28] sm:$0xff]  ;;  %v517_v26 = vld [vmem:[%s1641_s3 + $0x38] sm:$0xff]  ;;  %p1147_p6 = scmp.ne.s32.totalorder %s1592_s15, %s1146_s28  ;;  %p1154_p10 = scmp.lt.s32.totalorder %s1152_s11, %s1146_s28 }
  0x50   : > { %1025 = vmatpush3.bf16.msra.mxu0 %v1024_v39  ;;  %1063 = vmatpush3.bf16.msra.mxu1 %v1024_v39  ;;  %v1038_v21 = vpack.c.bf16 %v513_v20, %v512_v19  ;;  %v1042_v24 = vpack.c.bf16 %v515_v23, %v514_v22  ;;  %v516_v25 = vld [vmem:[%s1641_s3 + $0x30] sm:$0xff]  ;;  %v1519_v30 = vld [vmem:[%s1640_s2] ss:$0 sm:$0xff] }
  0x51   : > { %1027 = vmatprep.subr.bf16.mxu0 %v1026_v40  ;;  %1056 = vmatprep.subr.bf16.mxu1 %v1026_v40  ;;  %v1046_v27 = vpack.c.bf16 %v517_v26, %v516_v25  ;;  %p1148_p12 = pnand %p1147_p6, %p1650_p11  ;;  %p1155_p0 = por %p1154_p10, %p1153_p8 }
  0x53   : > { %p1149_p13 = pneg %p1148_p12 }
  0x54   : > { %1029 = vmatpush3.bf16.msra.mxu0 %v1028_v45  ;;  %1064 = vmatpush3.bf16.msra.mxu1 %v1028_v45 }
  0x55   : > { %1031 = vmatprep.subr.bf16.mxu0 %v1030_v46  ;;  %1057 = vmatprep.subr.bf16.mxu1 %v1030_v46  ;;  %p1156_p2 = pnand %p1155_p0, %p1149_p13 }
  0x58   : > { %1033 = vmatpush3.bf16.msra.mxu0 %v1032_v51  ;;  %1065 = vmatpush3.bf16.msra.mxu1 %v1032_v51 }
  0x59   : > { %1035 = vmatprep.subr.bf16.mxu1 %v1034_v52 }
  0x5b   : > { %382 = vmatmul.mubr.f32.vlgmr.msra.gmra.mrb[0].mxu0 %v246_v53  ;;  %442 = vmatmul.mubr.f32.vlgmr.msra.gmra.mrb[0].mxu1 %v270_v54 }
  0x5c   : > { %386 = vmatprep.mubr.f32.mxu0 %v249_v55  ;;  %446 = vmatprep.mubr.f32.mxu1 %v273_v56 }
  0x5d   : > { %1037 = vmatpush3.bf16.msra.mxu1 %v1034_v52 }
  0x5e   : > { %1039 = vmatprep.subr.bf16.mxu1 %v1038_v21 }
  0x5f   : > { %387 = vmatmul.mubr.f32.gmra.mrb[2].mxu0 %v248_v57  ;;  %447 = vmatmul.mubr.f32.gmra.mrb[2].mxu1 %v272_v58 }
  0x60   : > { %391 = vmatprep.mubr.f32.mxu0 %v251_v59  ;;  %451 = vmatprep.mubr.f32.mxu1 %v275_v60 }
  0x61   : > { %1041 = vmatpush3.bf16.msra.mxu1 %v1038_v21 }
  0x62   : > { %1043 = vmatprep.subr.bf16.mxu1 %v1042_v24 }
  0x63   : > { %392 = vmatmul.mubr.f32.gmra.mrb[4].mxu0 %v250_v61  ;;  %452 = vmatmul.mubr.f32.gmra.mrb[4].mxu1 %v274_v62 }
  0x64   : > { %396 = vmatprep.mubr.f32.mxu0 %v253_v63  ;;  %456 = vmatprep.mubr.f32.mxu1 %v277_v0 }
  0x65   : > { %1045 = vmatpush3.bf16.msra.mxu1 %v1042_v24 }
  0x66   : > { %1047 = vmatprep.subr.bf16.mxu1 %v1046_v27 }
  0x67   : > { %397 = vmatmul.mubr.f32.gmra.mrb[6].mxu0 %v252_v1  ;;  %457 = vmatmul.mubr.f32.gmra.mrb[6].mxu1 %v276_v2 }
  0x68   : > { %401 = vmatprep.mubr.f32.mxu0 %v255_v3 }
  0x69   : > { %1049 = vmatpush3.bf16.msra.mxu1 %v1046_v27 }
  0x6b   : > { %402 = vmatmul.mubr.f32.gmra.mrb[8].mxu0 %v254_v4 }
  0x6c   : > { %406 = vmatprep.mubr.f32.mxu0 %v257_v5 }
  0x6f   : > { %407 = vmatmul.mubr.f32.gmra.mrb[10].mxu0 %v256_v6 }
  0x70   : > { %411 = vmatprep.mubr.f32.mxu0 %v259_v7 }
  0x73   : > { %412 = vmatmul.mubr.f32.gmra.mrb[12].mxu0 %v258_v8 }
  0x74   : > { %416 = vmatprep.mubr.f32.mxu0 %v261_v9 }
  0x77   : > { %417 = vmatmul.mubr.f32.gmra.mrb[14].mxu0 %v260_v10 }
  0x78   : > { %421 = vmatprep.mubr.f32.mxu0 %v263_v11 }
  0x7b   : > { %422 = vmatmul.mubr.f32.gmra.mrb[16].mxu0 %v262_v12 }
  0x7c   : > { %426 = vmatprep.mubr.f32.mxu0 %v265_v13 }
  0x7f   : > { %427 = vmatmul.mubr.f32.gmra.mrb[18].mxu0 %v264_v14 }
  0x80   : > { %431 = vmatprep.mubr.f32.mxu0 %v267_v15 }
  0x83   : > { %432 = vmatmul.mubr.f32.gmra.mrb[20].mxu0 %v266_v16 }
  0x84   : > { %436 = vmatprep.mubr.f32.mxu0 %v269_v17 }
  0x87   : > { %437 = vmatmul.mubr.f32.gmra.mrb[22].mxu0 %v268_v18 }
 0x12e   : > { %v890_v28 = vpop.f32.mrb[0].mxu0  ;;  %v926_v29 = vpop.f32.mrb[0].mxu1 }
 0x12f   : > { %v891_v31 = vpop.f32.mrb[1].mxu0  ;;  %v927_v32 = vpop.f32.mrb[1].mxu1 }
 0x130   : > { %v892_v33 = vadd.f32 %v891_v31, %v890_v28  ;;  %v1521_v34 = vadd.f32 %v927_v32, %v926_v29 }
 0x132   : > { %v384_v35 = vadd.f32 %v892_v33, %v1519_v30  ;;  %v893_v36 = vpop.f32.mrb[2].mxu0  ;;  %v929_v37 = vpop.f32.mrb[2].mxu1 }
 0x133   : > { %v894_v38 = vpop.f32.mrb[3].mxu0  ;;  %v930_v39 = vpop.f32.mrb[3].mxu1 }
 0x134   : > { %v478_v40 = vmul.f32 0.01, %v384_v35  ;;  %v895_v41 = vadd.f32 %v894_v38, %v893_v36  ;;  %vm462_vm0 = vcmp.gt.f32.partialorder %v384_v35, 0.0  ;;  %v1524_v42 = vadd.f32 %v930_v39, %v929_v37 }
 0x136   : > { %v389_v43 = vadd.f32 %v895_v41, %v1519_v30  ;;  %v896_v44 = vpop.f32.mrb[4].mxu0  ;;  %v494_v45 = vsel %vm462_vm0, %v384_v35, %v478_v40  ;;  %v932_v46 = vpop.f32.mrb[4].mxu1 }
 0x137   : > { %v897_v47 = vpop.f32.mrb[5].mxu0  ;;  %978 = vmatprep.mubr.msk.f32.mxu1 %vm525_vm1, %v494_v45  ;;  %v933_v48 = vpop.f32.mrb[5].mxu1  ;;  %v444_v45 = vadd.f32 %v1521_v34, %v1519_v30 }
 0x138   : > { %vm463_vm2 = vcmp.gt.f32.partialorder %v389_v43, 0.0  ;;  %v479_v49 = vmul.f32 0.01, %v389_v43  ;;  %v898_v50 = vadd.f32 %v897_v47, %v896_v44  ;;  %v1528_v51 = vadd.f32 %v933_v48, %v932_v46 }
 0x139   : > { %vm474_vm13 = vcmp.gt.f32.partialorder %v444_v45, 0.0 }
 0x13a   : > { %v495_v52 = vsel %vm463_vm2, %v389_v43, %v479_v49  ;;  %v394_v53 = vadd.f32 %v898_v50, %v1519_v30  ;;  %v899_v54 = vpop.f32.mrb[6].mxu0  ;;  %v935_v55 = vpop.f32.mrb[6].mxu1  ;;  %v449_v49 = vadd.f32 %v1524_v42, %v1519_v30 }
 0x13b   : > { %v900_v56 = vpop.f32.mrb[7].mxu0  ;;  %979 = vmatmul.mubr.msk.f32.vlgmr.msra.gmra.mrb[8].mxu1 %vm525_vm1, %v495_v52  ;;  %v936_v57 = vpop.f32.mrb[7].mxu1 }
 0x13c   : > { %v480_v58 = vmul.f32 0.01, %v394_v53  ;;  %v901_v59 = vadd.f32 %v900_v56, %v899_v54  ;;  %vm464_vm3 = vcmp.gt.f32.partialorder %v394_v53, 0.0  ;;  %v1532_v60 = vadd.f32 %v936_v57, %v935_v55 }
 0x13d   : > { %v454_v54 = vadd.f32 %v1528_v51, %v1519_v30  ;;  %v491_v34 = vmul.f32 0.01, %v449_v49  ;;  %vm475_vm14 = vcmp.gt.f32.partialorder %v449_v49, 0.0 }
 0x13e   : > { %v399_v61 = vadd.f32 %v901_v59, %v1519_v30  ;;  %v902_v62 = vpop.f32.mrb[8].mxu0  ;;  %v496_v63 = vsel %vm464_vm3, %v394_v53, %v480_v58  ;;  %v490_v53 = vmul.f32 0.01, %v444_v45  ;;  %v459_v56 = vadd.f32 %v1532_v60, %v1519_v30 }
 0x13f   : > { %v903_v0 = vpop.f32.mrb[9].mxu0  ;;  %981 = vmatprep.mubr.msk.f32.mxu1 %vm525_vm1, %v496_v63  ;;  %v492_v58 = vmul.f32 0.01, %v454_v54  ;;  %vm476_vm15 = vcmp.gt.f32.partialorder %v454_v54, 0.0  ;;  %v507_v59 = vsel %vm475_vm14, %v449_v49, %v491_v34 }
 0x140   : > { %v481_v1 = vmul.f32 0.01, %v399_v61  ;;  %v904_v2 = vadd.f32 %v903_v0, %v902_v62  ;;  %vm465_vm4 = vcmp.gt.f32.partialorder %v399_v61, 0.0  ;;  %v506_v42 = vsel %vm474_vm13, %v444_v45, %v490_v53 }
 0x141   : > { %v493_v51 = vmul.f32 0.01, %v459_v56  ;;  %vm477_vm0 = vcmp.gt.f32.partialorder %v459_v56, 0.0 }
 0x142   : > { %v404_v3 = vadd.f32 %v904_v2, %v1519_v30  ;;  %v905_v4 = vpop.f32.mrb[10].mxu0  ;;  %v497_v5 = vsel %vm465_vm4, %v399_v61, %v481_v1  ;;  %v508_v61 = vsel %vm476_vm15, %v454_v54, %v492_v58 }
 0x143   : > { %v906_v6 = vpop.f32.mrb[11].mxu0  ;;  %982 = vmatmul.mubr.msk.f32.gmra.mrb[10].mxu1 %vm525_vm1, %v497_v5  ;;  %v509_v62 = vsel %vm477_vm0, %v459_v56, %v493_v51 }
 0x144   : > { %v482_v7 = vmul.f32 0.01, %v404_v3  ;;  %v907_v8 = vadd.f32 %v906_v6, %v905_v4  ;;  %vm466_vm5 = vcmp.gt.f32.partialorder %v404_v3, 0.0 }
 0x146   : > { %v409_v9 = vadd.f32 %v907_v8, %v1519_v30  ;;  %v908_v10 = vpop.f32.mrb[12].mxu0  ;;  %v498_v11 = vsel %vm466_vm5, %v404_v3, %v482_v7 }
 0x147   : > { %v909_v12 = vpop.f32.mrb[13].mxu0  ;;  %984 = vmatprep.mubr.msk.f32.mxu1 %vm525_vm1, %v498_v11 }
 0x148   : > { %v483_v13 = vmul.f32 0.01, %v409_v9  ;;  %v910_v14 = vadd.f32 %v909_v12, %v908_v10  ;;  %vm467_vm6 = vcmp.gt.f32.partialorder %v409_v9, 0.0 }
 0x14a   : > { %v414_v15 = vadd.f32 %v910_v14, %v1519_v30  ;;  %v911_v16 = vpop.f32.mrb[14].mxu0  ;;  %v499_v17 = vsel %vm467_vm6, %v409_v9, %v483_v13 }
 0x14b   : > { %v912_v18 = vpop.f32.mrb[15].mxu0  ;;  %985 = vmatmul.mubr.msk.f32.gmra.mrb[12].mxu1 %vm525_vm1, %v499_v17 }
 0x14c   : > { %v484_v19 = vmul.f32 0.01, %v414_v15  ;;  %v913_v20 = vadd.f32 %v912_v18, %v911_v16  ;;  %vm468_vm7 = vcmp.gt.f32.partialorder %v414_v15, 0.0 }
 0x14e   : > { %v419_v21 = vadd.f32 %v913_v20, %v1519_v30  ;;  %v914_v22 = vpop.f32.mrb[16].mxu0  ;;  %v500_v23 = vsel %vm468_vm7, %v414_v15, %v484_v19 }
 0x14f   : > { %v915_v24 = vpop.f32.mrb[17].mxu0  ;;  %987 = vmatprep.mubr.msk.f32.mxu1 %vm525_vm1, %v500_v23 }
 0x150   : > { %v485_v25 = vmul.f32 0.01, %v419_v21  ;;  %v916_v26 = vadd.f32 %v915_v24, %v914_v22  ;;  %vm469_vm8 = vcmp.gt.f32.partialorder %v419_v21, 0.0 }
 0x152   : > { %v424_v27 = vadd.f32 %v916_v26, %v1519_v30  ;;  %v917_v28 = vpop.f32.mrb[18].mxu0  ;;  %v501_v29 = vsel %vm469_vm8, %v419_v21, %v485_v25 }
 0x153   : > { %v918_v31 = vpop.f32.mrb[19].mxu0  ;;  %988 = vmatmul.mubr.msk.f32.gmra.mrb[14].mxu1 %vm525_vm1, %v501_v29 }
 0x154   : > { %v486_v32 = vmul.f32 0.01, %v424_v27  ;;  %v919_v33 = vadd.f32 %v918_v31, %v917_v28  ;;  %vm470_vm9 = vcmp.gt.f32.partialorder %v424_v27, 0.0 }
 0x156   : > { %v429_v35 = vadd.f32 %v919_v33, %v1519_v30  ;;  %v920_v36 = vpop.f32.mrb[20].mxu0  ;;  %v502_v37 = vsel %vm470_vm9, %v424_v27, %v486_v32 }
 0x157   : > { %v921_v38 = vpop.f32.mrb[21].mxu0  ;;  %990 = vmatprep.mubr.msk.f32.mxu1 %vm525_vm1, %v502_v37 }
 0x158   : > { %v487_v39 = vmul.f32 0.01, %v429_v35  ;;  %v922_v40 = vadd.f32 %v921_v38, %v920_v36  ;;  %vm471_vm10 = vcmp.gt.f32.partialorder %v429_v35, 0.0 }
 0x15a   : > { %v434_v41 = vadd.f32 %v922_v40, %v1519_v30  ;;  %v923_v43 = vpop.f32.mrb[22].mxu0  ;;  %v503_v44 = vsel %vm471_vm10, %v429_v35, %v487_v39 }
 0x15b   : > { %v924_v46 = vpop.f32.mrb[23].mxu0  ;;  %991 = vmatmul.mubr.msk.f32.gmra.mrb[16].mxu1 %vm525_vm1, %v503_v44 }
 0x15c   : > { %v488_v47 = vmul.f32 0.01, %v434_v41  ;;  %v925_v48 = vadd.f32 %v924_v46, %v923_v43  ;;  %vm472_vm11 = vcmp.gt.f32.partialorder %v434_v41, 0.0 }
 0x15e   : > { %v439_v50 = vadd.f32 %v925_v48, %v1519_v30  ;;  %v504_v52 = vsel %vm472_vm11, %v434_v41, %v488_v47  ;;  %v833_v30 = vld [vmem:[%s1642_s4] ss:$0 sm:$0xff] }
 0x15f   : > { %993 = vmatprep.mubr.msk.f32.mxu1 %vm525_vm1, %v504_v52 }
 0x160   : > { %v489_v55 = vmul.f32 0.01, %v439_v50  ;;  %vm473_vm12 = vcmp.gt.f32.partialorder %v439_v50, 0.0 }
 0x162   : > { %v505_v57 = vsel %vm473_vm12, %v439_v50, %v489_v55 }
 0x163   : > { %994 = vmatmul.mubr.msk.f32.gmra.mrb[18].mxu1 %vm525_vm1, %v505_v57 }
 0x164   : > { %996 = vmatprep.mubr.msk.f32.mxu1 %vm525_vm1, %v506_v42 }
 0x167   : > { %997 = vmatmul.mubr.msk.f32.gmra.mrb[20].mxu1 %vm525_vm1, %v507_v59 }
 0x168   : > { %999 = vmatprep.mubr.msk.f32.mxu1 %vm525_vm1, %v508_v61 }
 0x16b   : > { %1000 = vmatmul.mubr.msk.f32.gmra.mrb[22].mxu1 %vm525_vm1, %v509_v62 }
 0x20e   : > { %v980_v60 = vpop.f32.mrb[8].mxu1 }
 0x20f   : > { %v646_v63 = vadd.f32 %v980_v60, %v833_v30  ;;  %v640_v0 = vpop.f32.mrb[9].mxu1 }
 0x210   : > { %v641_v1 = vadd.f32 %v833_v30, %v640_v0 }
 0x211   : > { %720 = vst [vmem:[%s1569_s12 + $0x8] sm:$0xff] %v646_v63 }
 0x212   : > { %719 = vst [vmem:[%s1569_s12] sm:$0xff] %v641_v1 }
 0x216   : > { %v983_v2 = vpop.f32.mrb[10].mxu1 }
 0x217   : > { %v656_v3 = vadd.f32 %v983_v2, %v833_v30  ;;  %v650_v4 = vpop.f32.mrb[11].mxu1 }
 0x218   : > { %v651_v5 = vadd.f32 %v833_v30, %v650_v4 }
 0x219   : > { %722 = vst [vmem:[%s1569_s12 + $0x18] sm:$0xff] %v656_v3 }
 0x21a   : > { %721 = vst [vmem:[%s1569_s12 + $0x10] sm:$0xff] %v651_v5 }
 0x21e   : > { %v986_v6 = vpop.f32.mrb[12].mxu1 }
 0x21f   : > { %v666_v7 = vadd.f32 %v986_v6, %v833_v30  ;;  %v660_v8 = vpop.f32.mrb[13].mxu1 }
 0x220   : > { %v661_v9 = vadd.f32 %v833_v30, %v660_v8 }
 0x221   : > { %724 = vst [vmem:[%s1569_s12 + $0x28] sm:$0xff] %v666_v7 }
 0x222   : > { %723 = vst [vmem:[%s1569_s12 + $0x20] sm:$0xff] %v661_v9 }
 0x226   : > { %v989_v10 = vpop.f32.mrb[14].mxu1 }
 0x227   : > { %v676_v11 = vadd.f32 %v989_v10, %v833_v30  ;;  %v670_v12 = vpop.f32.mrb[15].mxu1 }
 0x228   : > { %v671_v13 = vadd.f32 %v833_v30, %v670_v12 }
 0x229   : > { %726 = vst [vmem:[%s1569_s12 + $0x38] sm:$0xff] %v676_v11 }
 0x22a   : > { %725 = vst [vmem:[%s1569_s12 + $0x30] sm:$0xff] %v671_v13 }
 0x22e   : > { %v992_v14 = vpop.f32.mrb[16].mxu1 }
 0x22f   : > { %v686_v15 = vadd.f32 %v992_v14, %v833_v30  ;;  %v680_v16 = vpop.f32.mrb[17].mxu1 }
 0x230   : > { %v681_v17 = vadd.f32 %v833_v30, %v680_v16 }
 0x231   : > { %728 = vst [vmem:[%s1569_s12 + $0x48] sm:$0xff] %v686_v15 }
 0x232   : > { %727 = vst [vmem:[%s1569_s12 + $0x40] sm:$0xff] %v681_v17 }
 0x236   : > { %v995_v18 = vpop.f32.mrb[18].mxu1 }
 0x237   : > { %v696_v19 = vadd.f32 %v995_v18, %v833_v30  ;;  %v690_v20 = vpop.f32.mrb[19].mxu1 }
 0x238   : > { %v691_v21 = vadd.f32 %v833_v30, %v690_v20 }
 0x239   : > { %730 = vst [vmem:[%s1569_s12 + $0x58] sm:$0xff] %v696_v19 }
 0x23a   : > { %729 = vst [vmem:[%s1569_s12 + $0x50] sm:$0xff] %v691_v21  ;;  %v998_v22 = vpop.f32.mrb[20].mxu1 }
 0x23b   : > { %v706_v23 = vadd.f32 %v998_v22, %v833_v30  ;;  %v700_v24 = vpop.f32.mrb[21].mxu1 }
 0x23c   : > { %v701_v25 = vadd.f32 %v833_v30, %v700_v24 }
 0x23d   : > { %732 = vst [vmem:[%s1569_s12 + $0x68] sm:$0xff] %v706_v23 }
 0x23e   : > { %731 = vst [vmem:[%s1569_s12 + $0x60] sm:$0xff] %v701_v25  ;;  %v1001_v26 = vpop.f32.mrb[22].mxu1 }
 0x23f   : > { %v716_v27 = vadd.f32 %v1001_v26, %v833_v30  ;;  %v710_v28 = vpop.f32.mrb[23].mxu1 }
 0x240   : > { %v711_v29 = vadd.f32 %v833_v30, %v710_v28 }
 0x241   : > { %734 = vst [vmem:[%s1569_s12 + $0x78] sm:$0xff] %v716_v27 }
 0x242   : > { %733 = vst [vmem:[%s1569_s12 + $0x70] sm:$0xff] %v711_v29 }
 0x243   : > { %1159 = shalt.err (!%p1156_p2)
}
 0x244   : > { %s1160_s29 = scalar_lea.hbm %s1590_s7, 2048  ;;  %s1164_s25 = scalar_lea.hbm %s1643_s5, 4096 }
 0x245   : > { %p1161_p4 = scmp.ne.s32.totalorder %s1590_s7, %s1160_s29  ;;  %p1165_p9 = scmp.lt.u32.totalorder %s1590_s7, %s1643_s5 }
 0x246   : > { %p1166_p1 = scmp.lt.u32.totalorder %s1164_s25, %s1160_s29  ;;  %p1168_p6 = scmp.lt.u32.totalorder %s1160_s29, %s1590_s7 }
 0x247   : > { %p1162_p5 = pnand %p1161_p4, %p1650_p11 }
 0x248   : > { %p1167_p3 = por %p1166_p1, %p1165_p9 }
 0x249   : > { %p1163_p7 = pneg %p1162_p5 }
 0x24a   : > { %p1169_p12 = por %p1168_p6, %p1167_p3 }
 0x24c   : > { %p1170_p13 = pnand %p1169_p12, %p1163_p7 }
 0x24e   : > { %1173 = shalt.err (!%p1170_p13)
}
 0x24f   : > { %s1218_s14 = smov 128   ;;  %s1219_s16 = smov 8  }
 0x250   : > { %1068 = dma.vmem_to_hbm [thread:$0]  (%p1650_p11), %s1592_s15, 2048, %s1590_s7, %s736_s22, %s1218_s14, %s1218_s14, %s1219_s16  }
 0x251 PF: > { %s764_s8 = sand.u32 1, %s1200_s18   ;;  %p1651_p8 = scmp.ne.s32.totalorder %s1648_s6, 0 }
 0x252   : > { %p1652_p10 = scmp.ge.s32.totalorder %s1212_s21, 2  ;;  %s765_s28 = scalar_lea.sflag [#allocation4], %s764_s8 }
 0x254   : > { %p1075_p0 = pnand %p1652_p10, %p1651_p8 }
 0x256   : > { %1195 = dma.done.wait (!%p1075_p0), %s765_s28, 2048  }
 0x257   : > { %1197 = vsyncadd (!%p1075_p0), %s765_s28, 4294965248  ;;  %p18_p2 = scmp.ge.s32.totalorder %s1275_s24, 4   ;;  %s1653_s18 = smov %s1204_s19 }
 0x258   : > { %s1654_s19 = smov %s1208_s20  ;;  %s1655_s20 = smov %s1287_s27 }
 0x259   : > { %s1656_s21 = smov %s1275_s24  ;;  %20 = sbr.rel (!%p18_p2) target bundleno = 5 (0x5), region = 85 }
 0x260   :  { %770 = vsyncpa [#allocation3], 1 }
 0x261   :  { %772 = vsyncpa [#allocation3 + $0x1], 1 }
 0x262   :  { %773 = vsyncpa [#allocation4], 1 }
 0x263   :  { %775 = vsyncpa [#allocation4 + $0x1], 1 }

</bundles_post_ra>
